<compile_context>
chip_gen: v6e
topology: v6e:2x2x1
jax: 0.10.0
libtpu: 0.0.40
codegen_flags: <defaults>
</compile_context>

<pallas_src>
import functools

import jax
import jax.numpy as jnp
from jax.experimental import pallas as pl
from jax.experimental.pallas import tpu as pltpu

MIN_VALUE = -0.5
MAX_VALUE = 1.0
C_OUT = 3


def _fused_kernel(w_ref, b_ref, cb_ref, x_ref, out_ref, *, min_v, max_v):
    # w_ref, b_ref, cb_ref: (C,) f32 in SMEM  (weight, bias, clamp(bias))
    # x_ref:   (TB, Hp, W)      VMEM block: expanded input (odd rows are zero)
    # out_ref: (TB, C, Hp, L)   VMEM block: final interleaved output
    c_out = out_ref.shape[1]
    lout = out_ref.shape[3]

    xs = x_ref[...]                                    # (TB, Hp, W), read once per block

    planes = []
    for c in range(c_out):                             # static unroll over the 3 channels
        wt = w_ref[c]
        bs = b_ref[c]
        cb = cb_ref[c]                                 # clamp(b[c]) precomputed on host
        # One multiply+add+clip over the whole block; both pool taps are lane slices of it.
        # Odd rows of xs are zero => y == clamp(b) there => max(...) == clamp(b): correct.
        y = jnp.clip(xs * wt + bs, min_v, max_v)       # (TB, Hp, W)
        planes.append(jnp.maximum(jnp.maximum(y[:, :, 2:2 + lout],   # tap iw = l + 2
                                              y[:, :, 5:5 + lout]),  # tap iw = l + 5
                                  cb))                               # odd-column taps
    # Single whole-block store for all channels / rows / images in this grid step.
    out_ref[...] = jnp.stack(planes, axis=1)           # (TB, C, Hp, L)


def _pick_batch_tile(n, per_image_bytes, budget_bytes=8 << 20):
    """Largest divisor of n that fits the VMEM budget and keeps >= 2 grid steps (n > 1)."""
    if n <= 1:
        return 1
    tb = max(1, min(n // 2, budget_bytes // max(per_image_bytes, 1)))
    while n % tb:
        tb -= 1
    return max(tb, 1)


def model_forward(x, w, b, min_value=MIN_VALUE, max_value=MAX_VALUE):
    """x: (N, 1, H, W) f32, w: (1, C_OUT, 1, 1) f32, b: (C_OUT,) f32."""
    N, c_in, H, W = x.shape
    assert c_in == 1
    c_out = w.shape[1]
    Hp = 2 * H - 5            # conv-transpose output height
    L = W - 7                 # MaxPool1d output length
    Hm2 = H - 2               # number of even output rows
    assert Hp >= 1 and L >= 1, "spatial size too small for these hyper-params"

    x = x.astype(jnp.float32)
    w_vec = w.reshape(c_out).astype(jnp.float32)
    b_vec = b.reshape(c_out).astype(jnp.float32)
    cb_vec = jnp.clip(b_vec, min_value, max_value)     # clamp(b), hoisted out of the kernel

    # Expanded input: row 2j holds x[j+1, :], odd rows are zero (cheap XLA layout prep).
    xs_rows = x[:, 0, 1:H - 1, :]                                     # (N, Hm2, W)
    xe = jnp.stack([xs_rows, jnp.zeros_like(xs_rows)], axis=2)        # (N, Hm2, 2, W)
    xe = xe.reshape(N, 2 * Hm2, W)[:, :Hp, :]                         # (N, Hp, W)

    # Batch tile: double-buffered input + output block per image, in bytes.
    per_image_bytes = 2 * 4 * (Hp * W + c_out * Hp * L)
    TB = _pick_batch_tile(N, per_image_bytes)

    kern = functools.partial(_fused_kernel, min_v=float(min_value), max_v=float(max_value))

    return pl.pallas_call(
        kern,
        out_shape=jax.ShapeDtypeStruct((N, c_out, Hp, L), jnp.float32),
        grid=(N // TB,),
        in_specs=[
            pl.BlockSpec(memory_space=pltpu.MemorySpace.SMEM),        # w_vec
            pl.BlockSpec(memory_space=pltpu.MemorySpace.SMEM),        # b_vec
            pl.BlockSpec(memory_space=pltpu.MemorySpace.SMEM),        # clamp(b)
            pl.BlockSpec((TB, Hp, W), lambda n: (n, 0, 0)),           # expanded x tile
        ],
        out_specs=pl.BlockSpec((TB, c_out, Hp, L), lambda n: (n, 0, 0, 0)),
        compiler_params=pltpu.CompilerParams(
            dimension_semantics=("parallel",),        # batch-parallel; >=2 steps for v7x
            vmem_limit_bytes=48 * 1024 * 1024,        # above scoped defaults, < v7x physical
        ),
    )(w_vec, b_vec, cb_vec, xe)


def reference_forward(x, w, b, min_v, max_v):
    """Straightforward JAX reference: explicit conv-transpose, clamp, dilated maxpool."""
    N, _, H, W = x.shape
    c_out = w.shape[1]
    Hp, Wp = 2 * H - 5, 2 * W - 5
    conv = jnp.broadcast_to(b[None, :, None, None], (N, c_out, Hp, Wp))
    vals = (x[:, 0, 1:H - 1, 1:W - 1][:, None, :, :] * w[0, :, 0, 0][None, :, None, None]
            + b[None, :, None, None])
    conv = conv.at[:, :, 0:Hp:2, 0:Wp:2].set(vals)
    v3 = jnp.clip(conv, min_v, max_v)
    padded = jnp.pad(v3, ((0, 0), (0, 0), (0, 0), (1, 1)), constant_values=-jnp.inf)
    L_out = (Wp + 2 - 3 * 4 - 1) // 2 + 1
    cols = []
    for l in range(L_out):
        taps = jnp.stack([padded[..., 2 * l + 3 * t] for t in range(5)], axis=-1)
        cols.append(jnp.max(taps, axis=-1))
    return jnp.stack(cols, axis=-1)


if __name__ == "__main__":
    key = jax.random.PRNGKey(0)
    kx, kw, kb = jax.random.split(key, 3)

    N, C_IN, H, W = 4, 1, 16, 16
    x = jax.random.normal(kx, (N, C_IN, H, W), dtype=jnp.float32)
    weight = jax.random.normal(kw, (C_IN, C_OUT, 1, 1), dtype=jnp.float32) * 0.5
    bias = jax.random.normal(kb, (C_OUT,), dtype=jnp.float32) * 0.1

    out = jax.block_until_ready(model_forward(x, weight, bias))
    assert out.shape == (N, C_OUT, 2 * H - 5, W - 7), out.shape

    ref = reference_forward(x, weight, bias, MIN_VALUE, MAX_VALUE)
    if not bool(jnp.allclose(out, ref, atol=1e-5, rtol=1e-5)):
        raise AssertionError("Pallas kernel output does not match reference")

    print("KERNEL_OK")
</pallas_src>

<mosaic_0001>
module attributes {stable_mosaic.version = 11 : i64} {
  func.func @_fused_kernel(%arg0: i32, %arg1: memref<3xf32, #tpu.memory_space<smem>>, %arg2: memref<3xf32, #tpu.memory_space<smem>>, %arg3: memref<3xf32, #tpu.memory_space<smem>>, %arg4: memref<2x27x16xf32, #tpu.memory_space<vmem>>, %arg5: memref<2x3x27x9xf32, #tpu.memory_space<vmem>>) attributes {dimension_semantics = [#tpu.dimension_semantics<parallel>], iteration_bounds = array<i64: 2>, scalar_prefetch = 0 : i64, scratch_operands = 0 : i64, tpu.core_type = #tpu.core_type<tc>, window_params = [{transform_indices = @transform_0, window_bounds = array<i64: 3>}, {transform_indices = @transform_1, window_bounds = array<i64: 3>}, {transform_indices = @transform_2, window_bounds = array<i64: 3>}, {transform_indices = @transform_3, window_bounds = array<i64: 2, 27, 16>}, {transform_indices = @transform_4, window_bounds = array<i64: 2, 3, 27, 9>}]} {
    %c0 = arith.constant 0 : index
    %c0_0 = arith.constant 0 : index
    %c0_1 = arith.constant 0 : index
    %0 = vector.load %arg4[%c0, %c0_0, %c0_1] : memref<2x27x16xf32, #tpu.memory_space<vmem>>, vector<2x27x16xf32>
    %c0_2 = arith.constant 0 : index
    %1 = memref.load %arg1[%c0_2] : memref<3xf32, #tpu.memory_space<smem>>
    %c0_3 = arith.constant 0 : index
    %2 = memref.load %arg2[%c0_3] : memref<3xf32, #tpu.memory_space<smem>>
    %c0_4 = arith.constant 0 : index
    %3 = memref.load %arg3[%c0_4] : memref<3xf32, #tpu.memory_space<smem>>
    %4 = vector.broadcast %1 : f32 to vector<2x27x16xf32>
    %5 = arith.mulf %0, %4 : vector<2x27x16xf32>
    %6 = vector.broadcast %2 : f32 to vector<2x27x16xf32>
    %7 = arith.addf %5, %6 : vector<2x27x16xf32>
    %cst = arith.constant -5.000000e-01 : f32
    %cst_5 = arith.constant 1.000000e+00 : f32
    %8 = vector.broadcast %cst : f32 to vector<2x27x16xf32>
    %9 = arith.maximumf %8, %7 : vector<2x27x16xf32>
    %10 = vector.broadcast %cst_5 : f32 to vector<2x27x16xf32>
    %11 = arith.minimumf %10, %9 : vector<2x27x16xf32>
    %12 = vector.extract_strided_slice %11 {offsets = [0, 0, 2], sizes = [2, 27, 9], strides = [1, 1, 1]} : vector<2x27x16xf32> to vector<2x27x9xf32>
    %13 = vector.extract_strided_slice %11 {offsets = [0, 0, 5], sizes = [2, 27, 9], strides = [1, 1, 1]} : vector<2x27x16xf32> to vector<2x27x9xf32>
    %14 = arith.maximumf %12, %13 : vector<2x27x9xf32>
    %15 = vector.broadcast %3 : f32 to vector<2x27x9xf32>
    %16 = arith.maximumf %14, %15 : vector<2x27x9xf32>
    %c1 = arith.constant 1 : index
    %17 = memref.load %arg1[%c1] : memref<3xf32, #tpu.memory_space<smem>>
    %c1_6 = arith.constant 1 : index
    %18 = memref.load %arg2[%c1_6] : memref<3xf32, #tpu.memory_space<smem>>
    %c1_7 = arith.constant 1 : index
    %19 = memref.load %arg3[%c1_7] : memref<3xf32, #tpu.memory_space<smem>>
    %20 = vector.broadcast %17 : f32 to vector<2x27x16xf32>
    %21 = arith.mulf %0, %20 : vector<2x27x16xf32>
    %22 = vector.broadcast %18 : f32 to vector<2x27x16xf32>
    %23 = arith.addf %21, %22 : vector<2x27x16xf32>
    %cst_8 = arith.constant -5.000000e-01 : f32
    %cst_9 = arith.constant 1.000000e+00 : f32
    %24 = vector.broadcast %cst_8 : f32 to vector<2x27x16xf32>
    %25 = arith.maximumf %24, %23 : vector<2x27x16xf32>
    %26 = vector.broadcast %cst_9 : f32 to vector<2x27x16xf32>
    %27 = arith.minimumf %26, %25 : vector<2x27x16xf32>
    %28 = vector.extract_strided_slice %27 {offsets = [0, 0, 2], sizes = [2, 27, 9], strides = [1, 1, 1]} : vector<2x27x16xf32> to vector<2x27x9xf32>
    %29 = vector.extract_strided_slice %27 {offsets = [0, 0, 5], sizes = [2, 27, 9], strides = [1, 1, 1]} : vector<2x27x16xf32> to vector<2x27x9xf32>
    %30 = arith.maximumf %28, %29 : vector<2x27x9xf32>
    %31 = vector.broadcast %19 : f32 to vector<2x27x9xf32>
    %32 = arith.maximumf %30, %31 : vector<2x27x9xf32>
    %c2 = arith.constant 2 : index
    %33 = memref.load %arg1[%c2] : memref<3xf32, #tpu.memory_space<smem>>
    %c2_10 = arith.constant 2 : index
    %34 = memref.load %arg2[%c2_10] : memref<3xf32, #tpu.memory_space<smem>>
    %c2_11 = arith.constant 2 : index
    %35 = memref.load %arg3[%c2_11] : memref<3xf32, #tpu.memory_space<smem>>
    %36 = vector.broadcast %33 : f32 to vector<2x27x16xf32>
    %37 = arith.mulf %0, %36 : vector<2x27x16xf32>
    %38 = vector.broadcast %34 : f32 to vector<2x27x16xf32>
    %39 = arith.addf %37, %38 : vector<2x27x16xf32>
    %cst_12 = arith.constant -5.000000e-01 : f32
    %cst_13 = arith.constant 1.000000e+00 : f32
    %40 = vector.broadcast %cst_12 : f32 to vector<2x27x16xf32>
    %41 = arith.maximumf %40, %39 : vector<2x27x16xf32>
    %42 = vector.broadcast %cst_13 : f32 to vector<2x27x16xf32>
    %43 = arith.minimumf %42, %41 : vector<2x27x16xf32>
    %44 = vector.extract_strided_slice %43 {offsets = [0, 0, 2], sizes = [2, 27, 9], strides = [1, 1, 1]} : vector<2x27x16xf32> to vector<2x27x9xf32>
    %45 = vector.extract_strided_slice %43 {offsets = [0, 0, 5], sizes = [2, 27, 9], strides = [1, 1, 1]} : vector<2x27x16xf32> to vector<2x27x9xf32>
    %46 = arith.maximumf %44, %45 : vector<2x27x9xf32>
    %47 = vector.broadcast %35 : f32 to vector<2x27x9xf32>
    %48 = arith.maximumf %46, %47 : vector<2x27x9xf32>
    %49 = vector.shape_cast %16 : vector<2x27x9xf32> to vector<2x1x27x9xf32>
    %50 = vector.shape_cast %32 : vector<2x27x9xf32> to vector<2x1x27x9xf32>
    %51 = vector.shape_cast %48 : vector<2x27x9xf32> to vector<2x1x27x9xf32>
    %52 = tpu.concatenate %49, %50, %51 in 1 : vector<2x1x27x9xf32>, vector<2x1x27x9xf32>, vector<2x1x27x9xf32> -> vector<2x3x27x9xf32>
    %c0_14 = arith.constant 0 : index
    %c0_15 = arith.constant 0 : index
    %c0_16 = arith.constant 0 : index
    %c0_17 = arith.constant 0 : index
    %53 = vector.load %arg5[%c0_14, %c0_15, %c0_16, %c0_17] : memref<2x3x27x9xf32, #tpu.memory_space<vmem>>, vector<2x3x27x9xf32>
    tpu.vector_store %arg5[%c0_14, %c0_15, %c0_16, %c0_17], %52 {strides = array<i32>} : memref<2x3x27x9xf32, #tpu.memory_space<vmem>>, vector<2x3x27x9xf32>,
    return
  }
  func.func @transform_0(%arg0: i32) -> i32 {
    %c0_i32 = arith.constant 0 : i32
    %c0_i32_0 = arith.constant 0 : i32
    return %c0_i32 : i32
  }
  func.func @transform_1(%arg0: i32) -> i32 {
    %c0_i32 = arith.constant 0 : i32
    %c0_i32_0 = arith.constant 0 : i32
    return %c0_i32 : i32
  }
  func.func @transform_2(%arg0: i32) -> i32 {
    %c0_i32 = arith.constant 0 : i32
    %c0_i32_0 = arith.constant 0 : i32
    return %c0_i32 : i32
  }
  func.func @transform_3(%arg0: i32) -> (i32, i32, i32) {
    %c0_i32 = arith.constant 0 : i32
    %c0_i32_0 = arith.constant 0 : i32
    %c0_i32_1 = arith.constant 0 : i32
    return %arg0, %c0_i32, %c0_i32_0 : i32, i32, i32
  }
  func.func @transform_4(%arg0: i32) -> (i32, i32, i32, i32) {
    %c0_i32 = arith.constant 0 : i32
    %c0_i32_0 = arith.constant 0 : i32
    %c0_i32_1 = arith.constant 0 : i32
    %c0_i32_2 = arith.constant 0 : i32
    return %arg0, %c0_i32, %c0_i32_0, %c0_i32_1 : i32, i32, i32, i32
  }
}

</mosaic_0001>

<bundles_post_ra>
// kernel: tpu_custom_call.1
= control target key start
LH: loop header
LB: loop body
LE: loop exit
PB: predicated region body
PF: predicated region fallthrough
CT: control target
= control target key end

     0   :  { %9 = vsyncpa [#allocation3], 0  ;;  %s1258_s0 = inlined_call_operand.vmem [shape: f32[3], index: 0, kind: input, shape index: {}]   ;;  %s1259_s1 = inlined_call_operand.vmem [shape: f32[3], index: 1, kind: input, shape index: {}]   ;;  %s1260_s2 = inlined_call_operand.vmem [shape: f32[3], index: 2, kind: input, shape index: {}]   ;;  %s1261_s3 = inlined_call_operand.vmem [shape: f32[4,27,16], index: 3, kind: input, shape index: {}]   ;;  %s1262_s4 = inlined_call_operand.vmem [shape: f32[4,3,27,9], index: 4, kind: output, shape index: {}]  }
   0x1   :  { %10 = vsyncpa [#allocation5], 0  ;;  %s880_s15 = smov 0  }
   0x2 LB: > { %s722_s16 = sadd.s32 4294967295, %s848_s15   ;;  %p724_p0 = scmp.ge.s32.totalorder %s848_s15, 1  ;;  %s848_s15 = sphi %s880_s15, %s16_s15  }
   0x3   : > { %p136_p1 = scmp.lt.s32.totalorder %s848_s15, 3  ;;  %s160_s19 = sshll.u32 %s1259_s1, 4  ;;  %s161_s19 = int_to_ptr.vmem [resolvable:$true] %s160_s19 }
   0x4   : > { %p897_p3 = scmp.eq.s32.totalorder %s722_s16, 0  ;;  %s149_s24 = sshll.u32 %s1258_s0, 4  ;;  %s150_s24 = int_to_ptr.vmem [resolvable:$true] %s149_s24 }
   0x5   : > { %p891_p2 = pnand %p724_p0, %p136_p1  ;;  %s171_s27 = sshll.u32 %s1260_s2, 4  ;;  %s915_s27 = int_to_ptr.vmem [resolvable:$true] %s171_s27 }
   0x6   : > { %s1267_s21 = scalar_select %p897_p3, 1, 0 }
   0x7   : > { %s1266_s20 = scalar_select %p891_p2, 1, 0 }
   0x8   : > { %p760_p4 = pneg %p891_p2  ;;  %s789_s29 = scalar_lea.vmem %s161_s19, 16 }
   0x9   : > { %p790_p6 = scmp.ne.s32.totalorder %s161_s19, %s789_s29  ;;  %p797_p10 = scmp.lt.s32.totalorder %s161_s19, %s161_s19 }
   0xa   : > { %p911_p5 = pnand %p897_p3, %p760_p4  ;;  %p798_p11 = scmp.lt.s32.totalorder %s789_s29, %s789_s29 }
   0xc   : > { %p791_p7 = pneg %p911_p5  ;;  %p799_p12 = por %p798_p11, %p797_p10 }
   0xe   : > { %p792_p8 = pnand %p791_p7, %p790_p6 }
  0x10   : > { %p793_p9 = pneg %p792_p8 }
  0x12   : > { %p800_p13 = pnand %p799_p12, %p793_p9 }
  0x14   : > { %803 = shalt.err (!%p800_p13)
}
  0x15   : > { %s850_s30 = smov [#allocation4]   ;;  %s804_s5 = scalar_lea.vmem %s150_s24, 16 }
  0x16   : > { %766 = dma.vmem_to_smem (!%p911_p5), %s161_s19, 16, %s850_s30, [#allocation5]  }
  0x17   : > { %p805_p0 = scmp.ne.s32.totalorder %s150_s24, %s804_s5  ;;  %p812_p3 = scmp.lt.s32.totalorder %s150_s24, %s150_s24 }
  0x18   : > { %p813_p2 = scmp.lt.s32.totalorder %s804_s5, %s804_s5 }
  0x19   : > { %p807_p1 = pnand %p805_p0, %p791_p7 }
  0x1a   : > { %p814_p6 = por %p813_p2, %p812_p3 }
  0x1b   : > { %p808_p4 = pneg %p807_p1 }
  0x1d   : > { %p815_p8 = pnand %p814_p6, %p808_p4 }
  0x1f   : > { %818 = shalt.err (!%p815_p8)
}
  0x20   : > { %s851_s6 = smov [#allocation2]   ;;  %s819_s7 = scalar_lea.vmem %s915_s27, 16 }
  0x21   : > { %763 = dma.vmem_to_smem (!%p911_p5), %s150_s24, 16, %s851_s6, [#allocation3]  }
  0x22   : > { %p820_p9 = scmp.ne.s32.totalorder %s915_s27, %s819_s7  ;;  %p827_p12 = scmp.lt.s32.totalorder %s915_s27, %s915_s27 }
  0x23   : > { %p828_p13 = scmp.lt.s32.totalorder %s819_s7, %s819_s7 }
  0x24   : > { %p822_p10 = pnand %p820_p9, %p791_p7 }
  0x25   : > { %p829_p2 = por %p828_p13, %p827_p12 }
  0x26   : > { %p823_p11 = pneg %p822_p10 }
  0x28   : > { %p830_p3 = pnand %p829_p2, %p823_p11 }
  0x2a   : > { %833 = shalt.err (!%p830_p3)
}
  0x2b   : > { %s852_s8 = smov [#allocation6]   ;;  %p1269_p0 = scmp.ne.s32.totalorder %s1266_s20, 0 }
  0x2c   : > { %769 = dma.vmem_to_smem (!%p911_p5), %s915_s27, 16, %s852_s8, [#allocation5]  }
  0x2d   : > { %194 = sbr.rel (%p1269_p0) target bundleno = 353 (0x161), region = 36  ;;  %p1270_p1 = scmp.ne.s32.totalorder (!%p1269_p0), %s1267_s21, 0 }
  0x32   : > { %839 = dma.done.wait (%p1270_p1), [#allocation3], 16  }
  0x33   : > { %841 = vsyncadd (%p1270_p1), [#allocation3], 4294967280 }
  0x34   : > { %843 = dma.done.wait (%p1270_p1), [#allocation5], 32  }
  0x35   : > { %845 = vsyncadd (%p1270_p1), [#allocation5], 4294967264 }
  0x36   : > { %208 = sfence }
  0x37   : > { %s733_s9 = sshll.u32 %s722_s16, 1  ;;  %s253_s10 = sld [smem:[#allocation2]]  ;;  %vm607_vm0 = vcmask 72704   ;;  %vm611_vm1 = vcmask 67584  }
  0x38   : > { %p232_p5 = scmp.lt.s32.totalorder %s733_s9, 3  ;;  %s254_s11 = sld [smem:[#allocation4]] }
  0x39   : > { %s738_s12 = sld [smem:[#allocation2 + $0x1]]  ;;  %s853_s21 = smov 125  }
  0x3a   : > { %s1272_s9 = smov (!%p232_p5, %s733_s9), 3  ;;  %s739_s13 = sld [smem:[#allocation4 + $0x1]] }
  0x3b   : > { %s746_s14 = sshll.u32 %s1272_s9, 5  ;;  %s741_s16 = sld [smem:[#allocation2 + $0x2]] }
  0x3c   : > { %s957_s19 = scalar_lea.vmem %s1261_s3, %s746_s14  ;;  %s742_s20 = sld [smem:[#allocation4 + $0x2]] }
  0x3d   : > { %v959_v0 = vstv %s253_s10  ;;  %v245_v1 = vld [vmem:[%s957_s19] sm:$0xff]  ;;  %v247_v3 = vld [vmem:[%s957_s19 + $0x10] sm:$0xff]  ;;  %v246_v4 = vld [vmem:[%s957_s19 + $0x8] sm:$0xff]  ;;  %s255_s22 = sld [smem:[#allocation6]]  ;;  %s854_s24 = smov 126  }
  0x3e   : > { %v962_v2 = vstv %s254_s11  ;;  %v257_v5 = vmul.f32 %v959_v0, %v245_v1  ;;  %v259_v6 = vmul.f32 %v959_v0, %v247_v3  ;;  %v258_v7 = vmul.f32 %v959_v0, %v246_v4  ;;  %v248_v8 = vld [vmem:[%s957_s19 + $0x18] sm:$0x7]  ;;  %v250_v46 = vld [vmem:[%s957_s19 + $0x28] sm:$0xff]  ;;  %v249_v47 = vld [vmem:[%s957_s19 + $0x20] sm:$0xff]  ;;  %s740_s23 = sld [smem:[#allocation6 + $0x1]]  ;;  %s747_s26 = smul.u32 96, %s1272_s9 }
  0x3f   : > { %v970_v9 = vstv %s738_s12  ;;  %v260_v10 = vmul.f32 %v959_v0, %v248_v8  ;;  %v262_v50 = vmul.f32 %v959_v0, %v250_v46  ;;  %v261_v51 = vmul.f32 %v959_v0, %v249_v47  ;;  %v252_v56 = vld [vmem:[%s957_s19 + $0x38] sm:$0x7]  ;;  %v251_v57 = vld [vmem:[%s957_s19 + $0x30] sm:$0xff]  ;;  %s743_s25 = sld [smem:[#allocation6 + $0x2]] }
  0x40   : > { %v344_v11 = vmul.f32 %v970_v9, %v246_v4  ;;  %v343_v12 = vmul.f32 %v970_v9, %v245_v1  ;;  %v266_v13 = vadd.f32 %v962_v2, %v257_v5  ;;  %v268_v14 = vadd.f32 %v962_v2, %v259_v6  ;;  %s1205_s29 = scalar_lea.vmem %s1262_s4, %s747_s26 }
  0x41   : > { %v267_v15 = vadd.f32 %v962_v2, %v258_v7  ;;  %v978_v16 = vstv %s739_s13  ;;  %v269_v17 = vadd.f32 %v962_v2, %v260_v10  ;;  %v346_v20 = vmul.f32 %v970_v9, %v248_v8 }
  0x42   : > { %v353_v18 = vadd.f32 %v978_v16, %v344_v11  ;;  %v352_v19 = vadd.f32 %v978_v16, %v343_v12  ;;  %v274_v21 = vmax.f32 %v266_v13, -0.5  ;;  %v276_v22 = vmax.f32 %v268_v14, -0.5 }
  0x43   : > { %v275_v23 = vmax.f32 %v267_v15, -0.5  ;;  %v345_v24 = vmul.f32 %v970_v9, %v247_v3  ;;  %v277_v25 = vmax.f32 %v269_v17, -0.5  ;;  %v355_v29 = vadd.f32 %v978_v16, %v346_v20 }
  0x44   : > { %v985_v26 = vmin.f32 %v274_v21, 1.0  ;;  %v987_v27 = vmin.f32 %v276_v22, 1.0  ;;  %v361_v28 = vmax.f32 %v353_v18, -0.5  ;;  %v360_v33 = vmax.f32 %v352_v19, -0.5 }
  0x45   : > { %v354_v30 = vadd.f32 %v978_v16, %v345_v24  ;;  %v995_v31 = vmin.f32 %v275_v23, 1.0  ;;  %v997_v32 = vmin.f32 %v277_v25, 1.0  ;;  %v999_v34 = vstv %s741_s16 }
  0x46   : > { %298 = vrot.lane.b32.xlu0 %v985_v26, %s853_s21  ;;  %302 = vrot.lane.b32.xlu1 %v987_v27, %s853_s21  ;;  %v430_v35 = vmul.f32 %v999_v34, %v246_v4  ;;  %v1002_v36 = vstv %s742_s20  ;;  %v429_v37 = vmul.f32 %v999_v34, %v245_v1  ;;  %v1005_v38 = vmin.f32 %v361_v28, 1.0 }
  0x47   : > { %v363_v39 = vmax.f32 %v355_v29, -0.5  ;;  %v362_v40 = vmax.f32 %v354_v30, -0.5  ;;  %v432_v41 = vmul.f32 %v999_v34, %v248_v8  ;;  %v1012_v42 = vmin.f32 %v360_v33, 1.0 }
  0x48   : > { %v439_v43 = vadd.f32 %v1002_v36, %v430_v35  ;;  %v438_v44 = vadd.f32 %v1002_v36, %v429_v37  ;;  %v431_v45 = vmul.f32 %v999_v34, %v247_v3  ;;  %v271_v58 = vadd.f32 %v962_v2, %v262_v50 }
  0x49   : > { %v1019_v48 = vmin.f32 %v363_v39, 1.0  ;;  %v1021_v49 = vmin.f32 %v362_v40, 1.0  ;;  %v441_v54 = vadd.f32 %v1002_v36, %v432_v41  ;;  %v270_v59 = vadd.f32 %v962_v2, %v261_v51 }
  0x4a   : > { %300 = vrot.lane.b32.xlu0 %v995_v31, %s853_s21  ;;  %304 = vrot.lane.b32.xlu1 %v997_v32, %s853_s21  ;;  %v447_v52 = vmax.f32 %v439_v43, -0.5  ;;  %v446_v53 = vmax.f32 %v438_v44, -0.5  ;;  %v440_v55 = vadd.f32 %v1002_v36, %v431_v45  ;;  %v264_v60 = vmul.f32 %v959_v0, %v252_v56 }
  0x4b   : > { %v263_v61 = vmul.f32 %v959_v0, %v251_v57  ;;  %v449_v1 = vmax.f32 %v441_v54, -0.5  ;;  %v279_v4 = vmax.f32 %v271_v58, -0.5  ;;  %v278_v5 = vmax.f32 %v270_v59, -0.5 }
  0x4c   : > { %v1041_v62 = vmin.f32 %v447_v52, 1.0  ;;  %v1043_v63 = vmin.f32 %v446_v53, 1.0  ;;  %v448_v3 = vmax.f32 %v440_v55, -0.5  ;;  %v273_v6 = vadd.f32 %v962_v2, %v264_v60 }
  0x4d   : > { %v272_v7 = vadd.f32 %v962_v2, %v263_v61  ;;  %v1051_v0 = vmin.f32 %v449_v1, 1.0  ;;  %v348_v10 = vmul.f32 %v970_v9, %v250_v46  ;;  %v347_v11 = vmul.f32 %v970_v9, %v249_v47 }
  0x4e   : > { %386 = vrot.lane.b32.xlu1 %v1005_v38, %s853_s21  ;;  %384 = vrot.lane.b32.xlu0 %v1012_v42, %s853_s21  ;;  %v1053_v8 = vmin.f32 %v448_v3, 1.0  ;;  %v1057_v12 = vmin.f32 %v279_v4, 1.0  ;;  %v281_v13 = vmax.f32 %v273_v6, -0.5  ;;  %v350_v2 = vmul.f32 %v970_v9, %v252_v56 }
  0x4f   : > { %v280_v14 = vmax.f32 %v272_v7, -0.5  ;;  %v1064_v15 = vmin.f32 %v278_v5, 1.0  ;;  %v357_v17 = vadd.f32 %v978_v16, %v348_v10  ;;  %v356_v18 = vadd.f32 %v978_v16, %v347_v11 }
  0x50   : > { %v349_v19 = vmul.f32 %v970_v9, %v251_v57  ;;  %v1069_v20 = vmin.f32 %v281_v13, 1.0  ;;  %v434_v22 = vmul.f32 %v999_v34, %v250_v46  ;;  %v433_v23 = vmul.f32 %v999_v34, %v249_v47 }
  0x51   : > { %v1071_v21 = vmin.f32 %v280_v14, 1.0  ;;  %v365_v24 = vmax.f32 %v357_v17, -0.5  ;;  %v364_v25 = vmax.f32 %v356_v18, -0.5  ;;  %v359_v28 = vadd.f32 %v978_v16, %v350_v2 }
  0x52   : > { %390 = vrot.lane.b32.xlu1 %v1019_v48, %s853_s21  ;;  %388 = vrot.lane.b32.xlu0 %v1021_v49, %s853_s21  ;;  %v358_v9 = vadd.f32 %v978_v16, %v349_v19  ;;  %v443_v29 = vadd.f32 %v1002_v36, %v434_v22  ;;  %v442_v30 = vadd.f32 %v1002_v36, %v433_v23  ;;  %v1123_v54 = vstv %s255_s22 }
  0x53   : > { %v436_v33 = vmul.f32 %v999_v34, %v252_v56  ;;  %v435_v35 = vmul.f32 %v999_v34, %v251_v57  ;;  %v1089_v37 = vmin.f32 %v365_v24, 1.0  ;;  %v1091_v39 = vmin.f32 %v364_v25, 1.0 }
  0x54   : > { %v367_v40 = vmax.f32 %v359_v28, -0.5  ;;  %v366_v16 = vmax.f32 %v358_v9, -0.5  ;;  %v451_v41 = vmax.f32 %v443_v29, -0.5  ;;  %v450_v45 = vmax.f32 %v442_v30, -0.5 }
  0x55   : > { %v445_v43 = vadd.f32 %v1002_v36, %v436_v33  ;;  %v444_v46 = vadd.f32 %v1002_v36, %v435_v35  ;;  %v1133_v6 = vstv %s740_s23  ;;  %v1147_v19 = vstv %s743_s25 }
  0x56   : > { %472 = vrot.lane.b32.xlu1 %v1041_v62, %s853_s21  ;;  %470 = vrot.lane.b32.xlu0 %v1043_v63, %s853_s21  ;;  %v1098_v34 = vmin.f32 %v367_v40, 1.0  ;;  %v1100_v44 = vmin.f32 %v366_v16, 1.0  ;;  %v1107_v47 = vmin.f32 %v451_v41, 1.0  ;;  %v1109_v50 = vmin.f32 %v450_v45, 1.0 }
  0x57   : > { %v453_v51 = vmax.f32 %v445_v43, -0.5  ;;  %v452_v52 = vmax.f32 %v444_v46, -0.5 }
  0x59   : > { %v1115_v53 = vmin.f32 %v453_v51, 1.0  ;;  %v1117_v36 = vmin.f32 %v452_v52, 1.0 }
  0x5a   : > { %476 = vrot.lane.b32.xlu1 %v1051_v0, %s853_s21  ;;  %474 = vrot.lane.b32.xlu0 %v1053_v8, %s853_s21 }
  0x5e   : > { %308 = vrot.lane.b32.xlu1 %v1057_v12, %s853_s21  ;;  %306 = vrot.lane.b32.xlu0 %v1064_v15, %s853_s21 }
  0x62   : > { %312 = vrot.lane.b32.xlu1 %v1069_v20, %s853_s21  ;;  %310 = vrot.lane.b32.xlu0 %v1071_v21, %s853_s21 }
  0x66   : > { %394 = vrot.lane.b32.xlu1 %v1089_v37, %s853_s21  ;;  %392 = vrot.lane.b32.xlu0 %v1091_v39, %s853_s21 }
  0x6a   : > { %398 = vrot.lane.b32.xlu1 %v1098_v34, %s853_s21  ;;  %396 = vrot.lane.b32.xlu0 %v1100_v44, %s853_s21 }
  0x6e   : > { %480 = vrot.lane.b32.xlu1 %v1107_v47, %s853_s21  ;;  %478 = vrot.lane.b32.xlu0 %v1109_v50, %s853_s21 }
  0x72   : > { %484 = vrot.lane.b32.xlu1 %v1115_v53, %s853_s21  ;;  %482 = vrot.lane.b32.xlu0 %v1117_v36, %s853_s21 }
  0xb8   : > { %v299_v55 = vpop.permute.xlu0 %298  ;;  %v303_v56 = vpop.permute.xlu1 %302 }
  0xb9   : > { %v322_v57 = vmax.f32 %v985_v26, %v299_v55  ;;  %v324_v58 = vmax.f32 %v987_v27, %v303_v56 }
  0xbb   : > { %v331_v59 = vmax.f32 %v322_v57, %v1123_v54  ;;  %v333_v1 = vmax.f32 %v324_v58, %v1123_v54 }
  0xbc   : > { %v301_v60 = vpop.permute.xlu0 %300  ;;  %v305_v61 = vpop.permute.xlu1 %304 }
  0xbd   : > { %v323_v3 = vmax.f32 %v995_v31, %v301_v60  ;;  %535 = vrot.lane.b32.xlu0 %v331_v59, %s854_s24  ;;  %v325_v4 = vmax.f32 %v997_v32, %v305_v61 }
  0xbf   : > { %v332_v5 = vmax.f32 %v323_v3, %v1123_v54  ;;  %v334_v27 = vmax.f32 %v325_v4, %v1123_v54 }
  0xc0   : > { %v387_v26 = vpop.permute.xlu1 %386  ;;  %v385_v7 = vpop.permute.xlu0 %384 }
  0xc1   : > { %539 = vrot.lane.b32.xlu0 %v333_v1, %s854_s24  ;;  %537 = vrot.lane.b32.xlu1 %v332_v5, %s854_s24  ;;  %v409_v31 = vmax.f32 %v1005_v38, %v387_v26  ;;  %v408_v10 = vmax.f32 %v1012_v42, %v385_v7 }
  0xc3   : > { %v417_v11 = vmax.f32 %v408_v10, %v1133_v6  ;;  %v418_v14 = vmax.f32 %v409_v31, %v1133_v6 }
  0xc4   : > { %v391_v32 = vpop.permute.xlu1 %390  ;;  %v389_v13 = vpop.permute.xlu0 %388 }
  0xc5   : > { %541 = vrot.lane.b32.xlu1 %v334_v27, %s854_s24  ;;  %v411_v2 = vmax.f32 %v1019_v48, %v391_v32  ;;  %v410_v17 = vmax.f32 %v1021_v49, %v389_v13  ;;  %543 = vrot.lane.b32.xlu0 %v417_v11, %s854_s24 }
  0xc7   : > { %v419_v18 = vmax.f32 %v410_v17, %v1133_v6  ;;  %v420_v22 = vmax.f32 %v411_v2, %v1133_v6 }
  0xc8   : > { %v473_v38 = vpop.permute.xlu1 %472  ;;  %v471_v42 = vpop.permute.xlu0 %470 }
  0xc9   : > { %545 = vrot.lane.b32.xlu1 %v418_v14, %s854_s24  ;;  %v495_v23 = vmax.f32 %v1041_v62, %v473_v38  ;;  %v494_v24 = vmax.f32 %v1043_v63, %v471_v42  ;;  %547 = vrot.lane.b32.xlu0 %v419_v18, %s854_s24 }
  0xcb   : > { %v503_v48 = vmax.f32 %v494_v24, %v1147_v19  ;;  %v504_v28 = vmax.f32 %v495_v23, %v1147_v19 }
  0xcc   : > { %v477_v49 = vpop.permute.xlu1 %476  ;;  %v475_v25 = vpop.permute.xlu0 %474 }
  0xcd   : > { %549 = vrot.lane.b32.xlu1 %v420_v22, %s854_s24  ;;  %v497_v9 = vmax.f32 %v1051_v0, %v477_v49  ;;  %v496_v29 = vmax.f32 %v1053_v8, %v475_v25  ;;  %551 = vrot.lane.b32.xlu0 %v503_v48, %s854_s24 }
  0xcf   : > { %v505_v62 = vmax.f32 %v496_v29, %v1147_v19  ;;  %v506_v33 = vmax.f32 %v497_v9, %v1147_v19 }
  0xd0   : > { %v309_v30 = vpop.permute.xlu1 %308  ;;  %v307_v63 = vpop.permute.xlu0 %306 }
  0xd1   : > { %553 = vrot.lane.b32.xlu1 %v504_v28, %s854_s24  ;;  %v327_v35 = vmax.f32 %v1057_v12, %v309_v30  ;;  %v326_v40 = vmax.f32 %v1064_v15, %v307_v63  ;;  %555 = vrot.lane.b32.xlu0 %v505_v62, %s854_s24 }
  0xd3   : > { %v335_v0 = vmax.f32 %v326_v40, %v1123_v54  ;;  %v336_v41 = vmax.f32 %v327_v35, %v1123_v54 }
  0xd4   : > { %v313_v16 = vpop.permute.xlu1 %312  ;;  %v311_v8 = vpop.permute.xlu0 %310 }
  0xd5   : > { %557 = vrot.lane.b32.xlu1 %v506_v33, %s854_s24  ;;  %v329_v43 = vmax.f32 %v1069_v20, %v313_v16  ;;  %v328_v45 = vmax.f32 %v1071_v21, %v311_v8  ;;  %559 = vrot.lane.b32.xlu0 %v335_v0, %s854_s24 }
  0xd7   : > { %v337_v12 = vmax.f32 %v328_v45, %v1123_v54  ;;  %v338_v51 = vmax.f32 %v329_v43, %v1123_v54 }
  0xd8   : > { %v395_v46 = vpop.permute.xlu1 %394  ;;  %v393_v15 = vpop.permute.xlu0 %392 }
  0xd9   : > { %561 = vrot.lane.b32.xlu1 %v336_v41, %s854_s24  ;;  %v413_v52 = vmax.f32 %v1089_v37, %v395_v46  ;;  %v412_v55 = vmax.f32 %v1091_v39, %v393_v15  ;;  %563 = vrot.lane.b32.xlu0 %v337_v12, %s854_s24 }
  0xdb   : > { %v421_v20 = vmax.f32 %v412_v55, %v1133_v6  ;;  %v422_v57 = vmax.f32 %v413_v52, %v1133_v6 }
  0xdc   : > { %v399_v56 = vpop.permute.xlu1 %398  ;;  %v397_v21 = vpop.permute.xlu0 %396 }
  0xdd   : > { %565 = vrot.lane.b32.xlu1 %v338_v51, %s854_s24  ;;  %v415_v58 = vmax.f32 %v1098_v34, %v399_v56  ;;  %v414_v54 = vmax.f32 %v1100_v44, %v397_v21  ;;  %567 = vrot.lane.b32.xlu0 %v421_v20, %s854_s24 }
  0xdf   : > { %v423_v37 = vmax.f32 %v414_v54, %v1133_v6  ;;  %v424_v60 = vmax.f32 %v415_v58, %v1133_v6 }
  0xe0   : > { %v481_v59 = vpop.permute.xlu1 %480  ;;  %v479_v39 = vpop.permute.xlu0 %478 }
  0xe1   : > { %569 = vrot.lane.b32.xlu1 %v422_v57, %s854_s24  ;;  %v499_v61 = vmax.f32 %v1107_v47, %v481_v59  ;;  %v498_v1 = vmax.f32 %v1109_v50, %v479_v39  ;;  %571 = vrot.lane.b32.xlu0 %v423_v37, %s854_s24 }
  0xe3   : > { %v507_v34 = vmax.f32 %v498_v1, %v1147_v19  ;;  %v508_v4 = vmax.f32 %v499_v61, %v1147_v19 }
  0xe4   : > { %v485_v44 = vpop.permute.xlu1 %484  ;;  %v483_v3 = vpop.permute.xlu0 %482 }
  0xe5   : > { %573 = vrot.lane.b32.xlu1 %v424_v60, %s854_s24  ;;  %v501_v5 = vmax.f32 %v1115_v53, %v485_v44  ;;  %v500_v6 = vmax.f32 %v1117_v36, %v483_v3  ;;  %575 = vrot.lane.b32.xlu0 %v507_v34, %s854_s24 }
  0xe7   : > { %v509_v47 = vmax.f32 %v500_v6, %v1147_v19  ;;  %v510_v50 = vmax.f32 %v501_v5, %v1147_v19 }
  0xe9   : > { %577 = vrot.lane.b32.xlu1 %v508_v4, %s854_s24  ;;  %579 = vrot.lane.b32.xlu0 %v509_v47, %s854_s24 }
  0xed   : > { %581 = vrot.lane.b32.xlu1 %v510_v50, %s854_s24 }
 0x12f   : > { %v536_v53 = vpop.permute.xlu0 %535 }
 0x130   : > { %608 = vst.msk [vmem:[%s1205_s29] sm:$0xff] %vm607_vm0, %v536_v53 }
 0x133   : > { %v538_v36 = vpop.permute.xlu1 %537  ;;  %v540_v26 = vpop.permute.xlu0 %539 }
 0x134   : > { %609 = vst.msk [vmem:[%s1205_s29 + $0x8] sm:$0xff] %vm607_vm0, %v538_v36  ;;  %610 = vst.msk [vmem:[%s1205_s29 + $0x10] sm:$0xff] %vm607_vm0, %v540_v26 }
 0x137   : > { %v542_v7 = vpop.permute.xlu1 %541  ;;  %v544_v27 = vpop.permute.xlu0 %543 }
 0x138   : > { %612 = vst.msk [vmem:[%s1205_s29 + $0x18] sm:$0x7] %vm611_vm1, %v542_v7 }
 0x139   : > { %613 = vst.msk [vmem:[%s1205_s29 + $0x20] sm:$0xff] %vm607_vm0, %v544_v27 }
 0x13b   : > { %v546_v31 = vpop.permute.xlu1 %545  ;;  %v548_v10 = vpop.permute.xlu0 %547 }
 0x13c   : > { %614 = vst.msk [vmem:[%s1205_s29 + $0x28] sm:$0xff] %vm607_vm0, %v546_v31  ;;  %615 = vst.msk [vmem:[%s1205_s29 + $0x30] sm:$0xff] %vm607_vm0, %v548_v10 }
 0x13f   : > { %v550_v11 = vpop.permute.xlu1 %549  ;;  %v552_v32 = vpop.permute.xlu0 %551 }
 0x140   : > { %616 = vst.msk [vmem:[%s1205_s29 + $0x38] sm:$0x7] %vm611_vm1, %v550_v11 }
 0x141   : > { %617 = vst.msk [vmem:[%s1205_s29 + $0x40] sm:$0xff] %vm607_vm0, %v552_v32 }
 0x143   : > { %v554_v13 = vpop.permute.xlu1 %553  ;;  %v556_v14 = vpop.permute.xlu0 %555 }
 0x144   : > { %618 = vst.msk [vmem:[%s1205_s29 + $0x48] sm:$0xff] %vm607_vm0, %v554_v13  ;;  %619 = vst.msk [vmem:[%s1205_s29 + $0x50] sm:$0xff] %vm607_vm0, %v556_v14 }
 0x147   : > { %v558_v2 = vpop.permute.xlu1 %557  ;;  %v560_v17 = vpop.permute.xlu0 %559 }
 0x148   : > { %620 = vst.msk [vmem:[%s1205_s29 + $0x58] sm:$0x7] %vm611_vm1, %v558_v2 }
 0x149   : > { %621 = vst.msk [vmem:[%s1205_s29 + $0x60] sm:$0xff] %vm607_vm0, %v560_v17 }
 0x14b   : > { %v562_v18 = vpop.permute.xlu1 %561  ;;  %v564_v19 = vpop.permute.xlu0 %563 }
 0x14c   : > { %622 = vst.msk [vmem:[%s1205_s29 + $0x68] sm:$0xff] %vm607_vm0, %v562_v18  ;;  %623 = vst.msk [vmem:[%s1205_s29 + $0x70] sm:$0xff] %vm607_vm0, %v564_v19 }
 0x14f   : > { %v566_v38 = vpop.permute.xlu1 %565  ;;  %v568_v42 = vpop.permute.xlu0 %567 }
 0x150   : > { %624 = vst.msk [vmem:[%s1205_s29 + $0x78] sm:$0x7] %vm611_vm1, %v566_v38 }
 0x151   : > { %625 = vst.msk [vmem:[%s1205_s29 + $0x80] sm:$0xff] %vm607_vm0, %v568_v42 }
 0x153   : > { %v570_v22 = vpop.permute.xlu1 %569  ;;  %v572_v23 = vpop.permute.xlu0 %571 }
 0x154   : > { %626 = vst.msk [vmem:[%s1205_s29 + $0x88] sm:$0xff] %vm607_vm0, %v570_v22  ;;  %627 = vst.msk [vmem:[%s1205_s29 + $0x90] sm:$0xff] %vm607_vm0, %v572_v23 }
 0x157   : > { %v574_v24 = vpop.permute.xlu1 %573  ;;  %v576_v48 = vpop.permute.xlu0 %575 }
 0x158   : > { %628 = vst.msk [vmem:[%s1205_s29 + $0x98] sm:$0x7] %vm611_vm1, %v574_v24 }
 0x159   : > { %629 = vst.msk [vmem:[%s1205_s29 + $0xa0] sm:$0xff] %vm607_vm0, %v576_v48 }
 0x15b   : > { %v578_v49 = vpop.permute.xlu1 %577  ;;  %v580_v25 = vpop.permute.xlu0 %579 }
 0x15c   : > { %630 = vst.msk [vmem:[%s1205_s29 + $0xa8] sm:$0xff] %vm607_vm0, %v578_v49  ;;  %631 = vst.msk [vmem:[%s1205_s29 + $0xb0] sm:$0xff] %vm607_vm0, %v580_v25 }
 0x15f   : > { %v582_v28 = vpop.permute.xlu1 %581 }
 0x160   : > { %632 = vst.msk [vmem:[%s1205_s29 + $0xb8] sm:$0x7] %vm611_vm1, %v582_v28 }
 0x161 PF: > { %s16_s15 = sadd.s32 1, %s848_s15  }
 0x162   : > { %p13_p7 = scmp.ge.s32.totalorder %s16_s15, 4  }
 0x164   :  { %15 = sbr.rel (!%p13_p7) target bundleno = 2 (0x2), region = 79 }
 0x169   :  { %657 = vsyncpa [#allocation3], 1 }
 0x16a   :  { %659 = vsyncpa [#allocation3 + $0x1], 1 }
 0x16b   :  { %660 = vsyncpa [#allocation5], 1 }

</bundles_post_ra>
